<compile_context>
chip_gen: v5e
topology: v5e:2x2
jax: 0.10.0
libtpu: 0.0.40
codegen_flags: <defaults>
</compile_context>

<pallas_src>
import functools

import jax
import jax.numpy as jnp
import numpy as np
from jax.experimental import pallas as pl
from jax.experimental.pallas import tpu as pltpu


def _round_up(x: int, m: int) -> int:
    return ((x + m - 1) // m) * m


def _custom_model_kernel(x_ref, w1t_ref, b1_ref, w2_ref, b2_ref, out_ref):
    # logits = x @ W1^T + b1.  W1^T is already (I, O), so this is a plain
    # (M,K)x(K,N) MXU matmul with f32 accumulation.  The activation cast happens
    # in-kernel so the bf16 path never writes a casted copy of x back to HBM.
    x = x_ref[...].astype(w1t_ref.dtype)
    logits = jnp.dot(x, w1t_ref[...], preferred_element_type=jnp.float32)
    f = jnp.maximum(logits + b1_ref[...], 0.0)          # bias-add + ReLU on VPU, f32
    # out = f @ W2 + b2.  W2 columns / b2 / out are padded to a lane-dense width.
    out_ref[...] = (
        jnp.dot(f.astype(w2_ref.dtype), w2_ref[...], preferred_element_type=jnp.float32)
        + b2_ref[...]
    )


def init_custom_model_params(S, THETA, bias, weight2, bias2, *, compute_dtype=jnp.float32):
    """One-time (model-init) weight prep: fuse the mask, transpose, pad, cast.

    Returns cached device arrays; per-forward-call cost is only the pallas_call.
      S, THETA: (O, I);  bias: (O,);  weight2: (O, O);  bias2: (O,).
    """
    O, I = S.shape
    O_out = _round_up(O, 128)                         # lane-dense final output width
    w1_t = (S * THETA).T.astype(compute_dtype)                                # (I, O)
    w2 = jnp.pad(weight2, ((0, 0), (0, O_out - O))).astype(compute_dtype)     # (O, O_out)
    b1 = bias.astype(jnp.float32).reshape(1, O)                               # (1, O)
    b2 = jnp.pad(bias2.astype(jnp.float32), (0, O_out - O)).reshape(1, O_out) # (1, O_out)
    return {"w1_t": w1_t, "w2": w2, "b1": b1, "b2": b2}


@functools.partial(jax.jit, static_argnames=("block_b",))
def custom_model_forward(x, params, *, block_b=128):
    """Fused CustomModel forward: relu(x @ W1^T + b1) @ W2 + b2.

    x: (B, I) float32; params from init_custom_model_params.  Returns (B, O) f32.
    """
    B, I = x.shape
    w1_t, w2, b1, b2 = params["w1_t"], params["w2"], params["b1"], params["b2"]
    O = w1_t.shape[1]
    O_out = w2.shape[1]

    # Batch tile: multiple of 8 (sublane rule); pad the batch only when needed.
    # (v6e: sweep block_b=256 for large B; v7x: pick block_b so B//block_b >= 2
    # to use both TensorCores.)
    tm = block_b if B > block_b else _round_up(B, 8)
    B_p = _round_up(B, tm)
    x_in = x if B_p == B else jnp.pad(x, ((0, B_p - B), (0, 0)))

    # Explicit VMEM budget: double-buffered x/out tiles + resident weights/biases.
    w_bytes = jnp.dtype(w1_t.dtype).itemsize
    vmem_need = (
        2 * (tm * I * x.dtype.itemsize + tm * O_out * 4)
        + 2 * ((I * O + O * O_out) * w_bytes + (O + O_out) * 4)
    )
    vmem_limit = int(min(64 * 1024 * 1024, max(32 * 1024 * 1024, 4 * vmem_need)))

    out_p = pl.pallas_call(
        _custom_model_kernel,
        out_shape=jax.ShapeDtypeStruct((B_p, O_out), jnp.float32),
        grid=(B_p // tm,),
        in_specs=[
            pl.BlockSpec((tm, I), lambda i: (i, 0)),      # x tile (batch-parallel)
            pl.BlockSpec((I, O), lambda i: (0, 0)),       # W1^T, VMEM-resident
            pl.BlockSpec((1, O), lambda i: (0, 0)),       # bias1
            pl.BlockSpec((O, O_out), lambda i: (0, 0)),   # W2,   VMEM-resident
            pl.BlockSpec((1, O_out), lambda i: (0, 0)),   # bias2
        ],
        out_specs=pl.BlockSpec((tm, O_out), lambda i: (i, 0)),
        compiler_params=pltpu.CompilerParams(
            dimension_semantics=("parallel",),
            vmem_limit_bytes=vmem_limit,
        ),
    )(x_in, w1_t, b1, w2, b2)

    # TODO(synk): for production O/I where resident W1^T/W2 no longer fit v7x's
    # 64 MiB/TC VMEM, add a reduction grid axis over I with an f32 VMEM
    # accumulator (dimension_semantics=("parallel","arbitrary")) and mark the
    # constant-index weight blocks pipeline_mode=pl.Buffered(1).

    out = out_p if B_p == B else out_p[:B]
    return out if O_out == O else out[:, :O]


if __name__ == "__main__":
    # Small shapes consistent with the module: batch=8, input_dim=32, output_dim=16.
    B, I, O = 8, 32, 16

    key = jax.random.PRNGKey(0)
    k_x, k_s, k_theta, k_w2 = jax.random.split(key, 4)

    # Input batch.
    x = jax.random.normal(k_x, (B, I), dtype=jnp.float32)

    # S: fixed 0/1 structure matrix passed to __init__.
    S = jax.random.bernoulli(k_s, p=0.5, shape=(O, I)).astype(jnp.float32)

    # THETA: kaiming_normal_ (fan_in, gain sqrt(2)) -> std = sqrt(2 / fan_in).
    theta_std = float(np.sqrt(2.0 / I))
    THETA = theta_std * jax.random.normal(k_theta, (O, I), dtype=jnp.float32)

    # bias: zeros (CustomLinearLayer).
    bias = jnp.zeros((O,), dtype=jnp.float32)

    # CustomModel second layer: 0.1 * randn(O, O) + eye(O); bias2 = zeros.
    weight2 = 0.1 * jax.random.normal(k_w2, (O, O), dtype=jnp.float32) + jnp.eye(
        O, dtype=jnp.float32
    )
    bias2 = jnp.zeros((O,), dtype=jnp.float32)

    # Plain-JAX reference mirroring the PyTorch CustomModel forward exactly.
    logits = ((x[:, None, :] * S[None, :, :]) * THETA[None, :, :]).sum(-1) + bias[None, :]
    ref = np.asarray(jnp.maximum(logits, 0.0) @ weight2 + bias2[None, :])

    # f32 compute path (default).
    params_f32 = init_custom_model_params(S, THETA, bias, weight2, bias2)
    out_f32 = jax.block_until_ready(custom_model_forward(x, params_f32))
    np.testing.assert_allclose(np.asarray(out_f32), ref, rtol=1e-4, atol=1e-4)

    # bf16 compute path (full-rate MXU, half the weight DMA; f32 accumulation).
    params_bf16 = init_custom_model_params(
        S, THETA, bias, weight2, bias2, compute_dtype=jnp.bfloat16
    )
    out_bf16 = jax.block_until_ready(custom_model_forward(x, params_bf16))
    np.testing.assert_allclose(np.asarray(out_bf16), ref, rtol=5e-2, atol=5e-2)

    print("KERNEL_OK")
</pallas_src>

<mosaic_0001>
module attributes {stable_mosaic.version = 11 : i64} {
  func.func @_custom_model_kernel(%arg0: i32, %arg1: memref<8x32xf32, #tpu.memory_space<vmem>>, %arg2: memref<32x16xf32, #tpu.memory_space<vmem>>, %arg3: memref<1x16xf32, #tpu.memory_space<vmem>>, %arg4: memref<16x128xf32, #tpu.memory_space<vmem>>, %arg5: memref<1x128xf32, #tpu.memory_space<vmem>>, %arg6: memref<8x128xf32, #tpu.memory_space<vmem>>) attributes {dimension_semantics = [#tpu.dimension_semantics<parallel>], iteration_bounds = array<i64: 1>, scalar_prefetch = 0 : i64, scratch_operands = 0 : i64, tpu.core_type = #tpu.core_type<tc>, window_params = [{transform_indices = @transform_0, window_bounds = array<i64: 8, 32>}, {pipeline_mode = #tpu.pipeline_mode<synchronous>, transform_indices = @transform_1, window_bounds = array<i64: 32, 16>}, {pipeline_mode = #tpu.pipeline_mode<synchronous>, transform_indices = @transform_2, window_bounds = array<i64: 1, 16>}, {pipeline_mode = #tpu.pipeline_mode<synchronous>, transform_indices = @transform_3, window_bounds = array<i64: 16, 128>}, {pipeline_mode = #tpu.pipeline_mode<synchronous>, transform_indices = @transform_4, window_bounds = array<i64: 1, 128>}, {transform_indices = @transform_5, window_bounds = array<i64: 8, 128>}]} {
    %c0 = arith.constant 0 : index
    %c0_0 = arith.constant 0 : index
    %0 = vector.load %arg1[%c0, %c0_0] : memref<8x32xf32, #tpu.memory_space<vmem>>, vector<8x32xf32>
    %c0_1 = arith.constant 0 : index
    %c0_2 = arith.constant 0 : index
    %1 = vector.load %arg2[%c0_1, %c0_2] : memref<32x16xf32, #tpu.memory_space<vmem>>, vector<32x16xf32>
    %cst = arith.constant dense<0.000000e+00> : vector<8x16xf32>
    %2 = tpu.matmul %0, %1, %cst {dimension_numbers = #tpu.dot_dimension_numbers<[1], [0], [0], [1], [0, 0, 1, 1], [], []>} : vector<8x32xf32>, vector<32x16xf32>, vector<8x16xf32> -> vector<8x16xf32>
    %c0_3 = arith.constant 0 : index
    %c0_4 = arith.constant 0 : index
    %3 = vector.load %arg3[%c0_3, %c0_4] : memref<1x16xf32, #tpu.memory_space<vmem>>, vector<1x16xf32>
    %4 = vector.broadcast %3 : vector<1x16xf32> to vector<8x16xf32>
    %5 = arith.addf %2, %4 : vector<8x16xf32>
    %cst_5 = arith.constant 0.000000e+00 : f32
    %6 = vector.broadcast %cst_5 : f32 to vector<8x16xf32>
    %7 = arith.maximumf %5, %6 : vector<8x16xf32>
    %c0_6 = arith.constant 0 : index
    %c0_7 = arith.constant 0 : index
    %8 = vector.load %arg4[%c0_6, %c0_7] : memref<16x128xf32, #tpu.memory_space<vmem>>, vector<16x128xf32>
    %cst_8 = arith.constant dense<0.000000e+00> : vector<8x128xf32>
    %9 = tpu.matmul %7, %8, %cst_8 {dimension_numbers = #tpu.dot_dimension_numbers<[1], [0], [0], [1], [0, 0, 1, 1], [], []>} : vector<8x16xf32>, vector<16x128xf32>, vector<8x128xf32> -> vector<8x128xf32>
    %c0_9 = arith.constant 0 : index
    %c0_10 = arith.constant 0 : index
    %10 = vector.load %arg5[%c0_9, %c0_10] : memref<1x128xf32, #tpu.memory_space<vmem>>, vector<1x128xf32>
    %11 = vector.broadcast %10 : vector<1x128xf32> to vector<8x128xf32>
    %12 = arith.addf %9, %11 : vector<8x128xf32>
    %c0_11 = arith.constant 0 : index
    %c0_12 = arith.constant 0 : index
    %13 = vector.load %arg6[%c0_11, %c0_12] : memref<8x128xf32, #tpu.memory_space<vmem>>, vector<8x128xf32>
    tpu.vector_store %arg6[%c0_11, %c0_12], %12 {strides = array<i32>} : memref<8x128xf32, #tpu.memory_space<vmem>>, vector<8x128xf32>,
    return
  }
  func.func @transform_0(%arg0: i32) -> (i32, i32) {
    %c0_i32 = arith.constant 0 : i32
    %c0_i32_0 = arith.constant 0 : i32
    return %arg0, %c0_i32 : i32, i32
  }
  func.func @transform_1(%arg0: i32) -> (i32, i32) {
    %c0_i32 = arith.constant 0 : i32
    %c0_i32_0 = arith.constant 0 : i32
    %c0_i32_1 = arith.constant 0 : i32
    return %c0_i32, %c0_i32_0 : i32, i32
  }
  func.func @transform_2(%arg0: i32) -> (i32, i32) {
    %c0_i32 = arith.constant 0 : i32
    %c0_i32_0 = arith.constant 0 : i32
    %c0_i32_1 = arith.constant 0 : i32
    return %c0_i32, %c0_i32_0 : i32, i32
  }
  func.func @transform_3(%arg0: i32) -> (i32, i32) {
    %c0_i32 = arith.constant 0 : i32
    %c0_i32_0 = arith.constant 0 : i32
    %c0_i32_1 = arith.constant 0 : i32
    return %c0_i32, %c0_i32_0 : i32, i32
  }
  func.func @transform_4(%arg0: i32) -> (i32, i32) {
    %c0_i32 = arith.constant 0 : i32
    %c0_i32_0 = arith.constant 0 : i32
    %c0_i32_1 = arith.constant 0 : i32
    return %c0_i32, %c0_i32_0 : i32, i32
  }
  func.func @transform_5(%arg0: i32) -> (i32, i32) {
    %c0_i32 = arith.constant 0 : i32
    %c0_i32_0 = arith.constant 0 : i32
    return %arg0, %c0_i32 : i32, i32
  }
}

</mosaic_0001>

<bundles_post_ra>
// kernel: custom_model_forward.1
= control target key start
LH: loop header
LB: loop body
LE: loop exit
PB: predicated region body
PF: predicated region fallthrough
CT: control target
= control target key end

     0   :  { %s194_s0 = inlined_call_operand.vmem [shape: f32[8,32], index: 0, kind: input, shape index: {}]   ;;  %s195_s1 = inlined_call_operand.vmem [shape: f32[32,16], index: 1, kind: input, shape index: {}]   ;;  %s196_s2 = inlined_call_operand.vmem [shape: f32[1,16], index: 2, kind: input, shape index: {}]   ;;  %s197_s3 = inlined_call_operand.vmem [shape: f32[16,128], index: 3, kind: input, shape index: {}]   ;;  %s198_s4 = inlined_call_operand.vmem [shape: f32[1,128], index: 4, kind: input, shape index: {}]   ;;  %s199_s5 = inlined_call_operand.hbm [shape: f32[8,128], index: 5, kind: output, shape index: {}]  }
   0x1   :  { %v25_v0 = vld [vmem:[%s195_s1 + $0x18] sm:$0xff]  ;;  %v24_v1 = vld [vmem:[%s195_s1 + $0x10] sm:$0xff]  ;;  %v23_v2 = vld [vmem:[%s195_s1 + $0x8] sm:$0xff] }
   0x2   :  { %46 = vmatpush.msra.mxu0 %v25_v0 }
   0x3   :  { %10 = vsyncpa [#allocation3], 0  ;;  %v22_v3 = vld [vmem:[%s195_s1] sm:$0xff]  ;;  %vm30_vm0 = vcmask 261120   ;;  %v56_v5 = vld [vmem:[%s197_s3 + $0x8] sm:$0xff]  ;;  %vm61_vm1 = vcmask 130048  }
   0x4   :  { %47 = vmatpush.msra.mxu0 %v24_v1  ;;  %v21_v4 = vld [vmem:[%s194_s0] sm:$0xff]  ;;  %79 = vmatpush.msra.mxu1 %v56_v5  ;;  %s133_s9 = smov [#allocation2]  }
   0x5   :  { %v55_v6 = vld [vmem:[%s197_s3] sm:$0xff]  ;;  %s91_s10 = sshll.u32 %s133_s9, 4  ;;  %s93_s3 = sshll.u32 %s199_s5, 4  ;;  %s92_s10 = int_to_ptr.vmem [resolvable:$true] %s91_s10  ;;  %s94_s3 = int_to_ptr.hbm [resolvable:$true] %s93_s3 }
   0x6   :  { %48 = vmatpush.msra.mxu0 %v23_v2  ;;  %80 = vmatpush.msra.mxu1 %v55_v6  ;;  %v105_v7 = vld [vmem:[%s196_s2] ss:$0 sm:$0xff] }
   0x7   :  { %v106_v11 = vld [vmem:[%s198_s4] ss:$0 sm:$0xff] }
   0x8   :  { %49 = vmatpush.msra.mxu0 %v22_v3 }
   0x9   :  { %102 = vmatmul.msk.f32.vlgmr.msra.gmra.mxu0 %vm30_vm0, %v21_v4 }
  0x86   :  { %v51_v8 = vpop.f32.mrf.mxu0 }
  0x87   :  { %v52_v9 = vadd.f32 %v105_v7, %v51_v8 }
  0x89   :  { %v54_v10 = vmax.f32 %v52_v9, 0.0 }
  0x8b   :  { %103 = vmatmul.msk.f32.vlgmr.msra.gmra.mxu1 %vm61_vm1, %v54_v10 }
 0x108   :  { %v82_v12 = vpop.f32.mrf.mxu1 }
 0x109   :  { %v83_v13 = vadd.f32 %v106_v11, %v82_v12 }
 0x10b   :  { %85 = vst [vmem:[#allocation2] sm:$0xff] %v83_v13 }
 0x10c   :  { %96 = dma.vmem_to_hbm [thread:$0]  %s92_s10, 128, %s94_s3, [#allocation3]  }
 0x10d   :  { %131 = dma.done.wait [#allocation3], 128  }
 0x10e   :  { %132 = vsyncadd [#allocation3], 4294967168 }
 0x10f   :  { %101 = vsyncpa [#allocation3], 1 }

</bundles_post_ra>
